<compile_context>
chip_gen: v6e
topology: v6e:2x2x1
jax: 0.10.0
libtpu: 0.0.40
codegen_flags: <defaults>
</compile_context>

<pallas_src>
import jax
import jax.numpy as jnp
from jax.experimental import pallas as pl
from jax.experimental.pallas import tpu as pltpu


def _linear_kernel(x_ref, w_ref, o_ref):
    """One K-tile of y_partial += x_tile @ w_tile.T (f32 accumulate)."""
    k = pl.program_id(1)

    @pl.when(k == 0)
    def _():
        o_ref[...] = jnp.zeros_like(o_ref)

    # x_tile: [B, tk], w_tile: [N, tk]  -> contract K (trans_b) -> [B, N]
    o_ref[...] += jax.lax.dot_general(
        x_ref[...],
        w_ref[...],
        dimension_numbers=(((1,), (1,)), ((), ())),
        preferred_element_type=jnp.float32,
    )


def linear_forward(x, weight, bias, *, tk=32768, num_splits=2):
    """y = x @ weight.T + bias  (exact nn.Linear semantics).

    x:      [B, K]
    weight: [N, K]   (native PyTorch layout — NOT transposed on host)
    bias:   [N]
    returns [B, N]
    """
    B, K = x.shape
    N, Kw = weight.shape
    assert K == Kw, "in_features mismatch"
    assert bias.shape == (N,), "bias shape mismatch"

    # --- choose a lane-aligned K tile, clamped for small problems ---
    tk = min(tk, pl.cdiv(K, num_splits))
    tk = max(128, ((tk + 127) // 128) * 128)      # multiple of 128 lanes

    # --- pad K so it divides evenly into (num_splits * tk) chunks ---
    chunk = num_splits * tk
    k_pad = pl.cdiv(K, chunk) * chunk
    if k_pad != K:
        # Zero columns contribute nothing to the contraction.
        x = jnp.pad(x, ((0, 0), (0, k_pad - K)))
        weight = jnp.pad(weight, ((0, 0), (0, k_pad - K)))

    k_steps = k_pad // tk
    ksteps_per_split = k_steps // num_splits
    grid = (num_splits, ksteps_per_split)

    partials = pl.pallas_call(
        _linear_kernel,
        out_shape=jax.ShapeDtypeStruct((num_splits, B, N), jnp.float32),
        grid_spec=pltpu.PrefetchScalarGridSpec(
            num_scalar_prefetch=0,
            grid=grid,
            in_specs=[
                # x K-tile, lane-dense along K
                pl.BlockSpec((B, tk), lambda c, k: (0, c * ksteps_per_split + k)),
                # weight K-tile in native [N, K] layout, lane-dense along K
                pl.BlockSpec((N, tk), lambda c, k: (0, c * ksteps_per_split + k)),
            ],
            # one [B, N] partial accumulator per core-split (resident over K)
            out_specs=pl.BlockSpec((None, B, N), lambda c, k: (c, 0, 0)),
        ),
        compiler_params=pltpu.CompilerParams(
            dimension_semantics=("parallel", "arbitrary"),
            vmem_limit_bytes=32 * 1024 * 1024,
        ),
        cost_estimate=pl.CostEstimate(
            flops=2 * B * K * N,
            bytes_accessed=4 * (B * K + N * K + B * N),
            transcendentals=0,
        ),
    )(x, weight)

    # Tiny epilogue: reduce the per-core partials and add the bias.
    y = partials.sum(axis=0) + bias[None, :]
    return y.astype(x.dtype)


if __name__ == "__main__":
    # Small-scale stand-in for subsample_size=500000 / num_classes.
    # K deliberately NOT a multiple of 128 to exercise the ragged-K path.
    B = 8          # batch
    K = 5000       # "subsample_size" (in_features), scaled down
    N = 16         # num_classes

    key = jax.random.PRNGKey(0)
    kx, kw, kb = jax.random.split(key, 3)

    x = jax.random.normal(kx, (B, K), dtype=jnp.float32)

    # Deterministic nn.Linear-style init: U(-1/sqrt(K), 1/sqrt(K))
    bound = 1.0 / (K ** 0.5)
    weight = jax.random.uniform(kw, (N, K), minval=-bound, maxval=bound,
                                dtype=jnp.float32)
    bias = jax.random.uniform(kb, (N,), minval=-bound, maxval=bound,
                              dtype=jnp.float32)

    y = linear_forward(x, weight, bias)
    y = jax.block_until_ready(y)

    # Correctness check against plain-JAX reference.
    y_ref = x @ weight.T + bias
    assert y.shape == (B, N), "output shape mismatch"
    assert jnp.allclose(y, y_ref, atol=1e-4, rtol=1e-4), "mismatch vs reference"

    print("KERNEL_OK")
</pallas_src>

<mosaic_0001>
module attributes {stable_mosaic.version = 11 : i64} {
  func.func @_linear_kernel(%arg0: i32, %arg1: i32, %arg2: memref<8x2560xf32, #tpu.memory_space<vmem>>, %arg3: memref<16x2560xf32, #tpu.memory_space<vmem>>, %arg4: memref<1x8x16xf32, #tpu.memory_space<vmem>>) attributes {dimension_semantics = [#tpu.dimension_semantics<parallel>, #tpu.dimension_semantics<arbitrary>], iteration_bounds = array<i64: 2, 1>, scalar_prefetch = 0 : i64, scratch_operands = 0 : i64, tpu.core_type = #tpu.core_type<tc>, window_params = [{transform_indices = @transform_0, window_bounds = array<i64: 8, 2560>}, {transform_indices = @transform_1, window_bounds = array<i64: 16, 2560>}, {transform_indices = @transform_2, window_bounds = array<i64: 1, 8, 16>}]} {
    %c0_i32 = arith.constant 0 : i32
    %0 = arith.cmpi eq, %arg1, %c0_i32 : i32
    %1 = arith.extui %0 : i1 to i32
    %c0_i32_0 = arith.constant 0 : i32
    %2 = arith.cmpi ne, %1, %c0_i32_0 : i32
    scf.if %2 {
      %cst_10 = arith.constant 0.000000e+00 : f32
      %12 = vector.broadcast %cst_10 : f32 to vector<8x16xf32>
      %c0_11 = arith.constant 0 : index
      %c0_12 = arith.constant 0 : index
      %c0_13 = arith.constant 0 : index
      %13 = vector.load %arg4[%c0_11, %c0_12, %c0_13] : memref<1x8x16xf32, #tpu.memory_space<vmem>>, vector<1x8x16xf32>
      %14 = vector.shape_cast %13 : vector<1x8x16xf32> to vector<8x16xf32>
      %15 = vector.shape_cast %12 : vector<8x16xf32> to vector<1x8x16xf32>
      tpu.vector_store %arg4[%c0_11, %c0_12, %c0_13], %15 {strides = array<i32>} : memref<1x8x16xf32, #tpu.memory_space<vmem>>, vector<1x8x16xf32>,
    } else {
    }
    %c0 = arith.constant 0 : index
    %c0_1 = arith.constant 0 : index
    %c0_2 = arith.constant 0 : index
    %3 = vector.load %arg4[%c0, %c0_1, %c0_2] : memref<1x8x16xf32, #tpu.memory_space<vmem>>, vector<1x8x16xf32>
    %4 = vector.shape_cast %3 : vector<1x8x16xf32> to vector<8x16xf32>
    %c0_3 = arith.constant 0 : index
    %c0_4 = arith.constant 0 : index
    %5 = vector.load %arg2[%c0_3, %c0_4] : memref<8x2560xf32, #tpu.memory_space<vmem>>, vector<8x2560xf32>
    %c0_5 = arith.constant 0 : index
    %c0_6 = arith.constant 0 : index
    %6 = vector.load %arg3[%c0_5, %c0_6] : memref<16x2560xf32, #tpu.memory_space<vmem>>, vector<16x2560xf32>
    %cst = arith.constant dense<0.000000e+00> : vector<8x16xf32>
    %7 = tpu.matmul %5, %6, %cst {dimension_numbers = #tpu.dot_dimension_numbers<[1], [1], [0], [0], [0, 0, 1, 0], [], []>} : vector<8x2560xf32>, vector<16x2560xf32>, vector<8x16xf32> -> vector<8x16xf32>
    %8 = arith.addf %4, %7 : vector<8x16xf32>
    %c0_7 = arith.constant 0 : index
    %c0_8 = arith.constant 0 : index
    %c0_9 = arith.constant 0 : index
    %9 = vector.load %arg4[%c0_7, %c0_8, %c0_9] : memref<1x8x16xf32, #tpu.memory_space<vmem>>, vector<1x8x16xf32>
    %10 = vector.shape_cast %9 : vector<1x8x16xf32> to vector<8x16xf32>
    %11 = vector.shape_cast %8 : vector<8x16xf32> to vector<1x8x16xf32>
    tpu.vector_store %arg4[%c0_7, %c0_8, %c0_9], %11 {strides = array<i32>} : memref<1x8x16xf32, #tpu.memory_space<vmem>>, vector<1x8x16xf32>,
    return
  }
  func.func @transform_0(%arg0: i32, %arg1: i32) -> (i32, i32) {
    %c1_i32 = arith.constant 1 : i32
    %0 = arith.muli %arg0, %c1_i32 : i32
    %1 = arith.addi %0, %arg1 : i32
    %c0_i32 = arith.constant 0 : i32
    %c0_i32_0 = arith.constant 0 : i32
    return %c0_i32, %1 : i32, i32
  }
  func.func @transform_1(%arg0: i32, %arg1: i32) -> (i32, i32) {
    %c1_i32 = arith.constant 1 : i32
    %0 = arith.muli %arg0, %c1_i32 : i32
    %1 = arith.addi %0, %arg1 : i32
    %c0_i32 = arith.constant 0 : i32
    %c0_i32_0 = arith.constant 0 : i32
    return %c0_i32, %1 : i32, i32
  }
  func.func @transform_2(%arg0: i32, %arg1: i32) -> (i32, i32, i32) {
    %c0_i32 = arith.constant 0 : i32
    %c0_i32_0 = arith.constant 0 : i32
    %c0_i32_1 = arith.constant 0 : i32
    return %arg0, %c0_i32, %c0_i32_0 : i32, i32, i32
  }
}

</mosaic_0001>

<bundles_post_ra>
// kernel: tpu_custom_call.1
= control target key start
LH: loop header
LB: loop body
LE: loop exit
PB: predicated region body
PF: predicated region fallthrough
CT: control target
= control target key end

     0   :  { %7 = vsyncpa [#allocation3], 0  ;;  %s1594_s0 = inlined_call_operand.hbm [shape: f32[8,5120], index: 0, kind: input, shape index: {}]   ;;  %s1595_s1 = inlined_call_operand.hbm [shape: f32[16,5120], index: 1, kind: input, shape index: {}]   ;;  %s1596_s2 = inlined_call_operand.hbm [shape: f32[2,8,16], index: 2, kind: output, shape index: {}]  }
   0x1   :  { %9 = vsyncpa [#allocation3 + $0x1], 0 }
   0x2   :  { %10 = vsyncpa [#allocation6], 0 }
   0x3   :  { %12 = vsyncpa [#allocation6 + $0x1], 0 }
   0x4   :  { %13 = vsyncpa [#allocation4], 0 }
   0x5   :  { %15 = vsyncpa [#allocation4 + $0x1], 0  ;;  %s1362_s9 = smov 0   ;;  %s1364_s10 = smov 0  }
   0x6   :  { %s1366_s11 = smov 0   ;;  %s1368_s12 = smov 0  }
   0x7   :  { %s1370_s13 = smov 0   ;;  %s1372_s14 = smov 0  }
   0x8 LB: > { %s1109_s15 = sadd.s32 4294967295, %s1338_s14   ;;  %s1110_s16 = sadd.s32 4294967294, %s1338_s14   ;;  %s1338_s14 = sphi %s1372_s14, %s21_s14   ;;  %s1334_s13 = sphi %s1370_s13, %s1608_s13   ;;  %s1330_s12 = sphi %s1368_s12, %s1607_s12   ;;  %s1326_s11 = sphi %s1366_s11, %s1606_s11   ;;  %s1322_s10 = sphi %s1364_s10, %s1605_s10   ;;  %s1318_s9 = sphi %s1362_s9, %s1604_s9  }
   0x9   : > { %s33_s17 = sadd.s32 1, %s1334_s13  ;;  %s42_s18 = sadd.s32 1, %s1326_s11 }
   0xa   : > { %p35_p0 = scmp.ge.s32.totalorder %s33_s17, 2  ;;  %p49_p1 = scmp.ne.s32.totalorder %s1326_s11, %s1322_s10 }
   0xb   : > { %p50_p2 = scmp.eq.s32.totalorder %s1338_s14, 0  ;;  %p55_p3 = scmp.ne.s32.totalorder %s1322_s10, %s1318_s9 }
   0xc   : > { %s1610_s17 = smov (%p35_p0, %s33_s17), 0  ;;  %p56_p5 = scmp.eq.s32.totalorder %s1109_s15, 0 }
   0xd   : > { %p1403_p4 = por %p50_p2, %p49_p1  ;;  %s39_s20 = ssub.s32 %s1334_s13, %s1610_s17 }
   0xe   : > { %p107_p6 = scmp.eq.s32.totalorder %s1109_s15, 1  ;;  %p40_p7 = scmp.eq.s32.totalorder %s39_s20, 0 }
   0xf   : > { %p1409_p8 = por %p56_p5, %p55_p3  ;;  %p113_p10 = scmp.eq.s32.totalorder %s1110_s16, 1 }
  0x10   : > { %p1413_p9 = por %p107_p6, %p49_p1  ;;  %p1144_p13 = scmp.lt.s32.totalorder %s1338_s14, 2 }
  0x11   : > { %s1418_s23 = scalar_select %p40_p7, %s1326_s11, %s42_s18  }
  0x12   : > { %p1420_p11 = por %p113_p10, %p55_p3  ;;  %s1427_s25 = sand.u32 1, %s1326_s11  }
  0x13   : > { %s1123_s26 = smul.u32 160, %s1427_s25  ;;  %p1433_p0 = pnand %p1144_p13, %p1403_p4 }
  0x14   : > { %s1121_s27 = smul.u32 2560, %s1334_s13  ;;  %s134_s6 = scalar_lea.sflag [#allocation3], %s1427_s25 }
  0x15   : > { %s137_s4 = scalar_lea.vmem [#allocation2], %s1123_s26  ;;  %p1200_p1 = pneg %p1433_p0 }
  0x16   : > { %s144_s3 = scalar_lea.hbm %s1594_s0, %s1121_s27  ;;  %s146_s5 = sshll.u32 %s137_s4, 4  ;;  %s147_s5 = int_to_ptr.vmem [resolvable:$true] %s146_s5 }
  0x17   : > { %s1211_s7 = scalar_lea.vmem %s147_s5, 2560  ;;  %s1340_s8 = smov [#allocation2]  }
  0x18   : > { %p1212_p2 = scmp.ne.s32.totalorder %s147_s5, %s1211_s7  ;;  %s1216_s15 = sshll.u32 %s1340_s8, 4  ;;  %s1217_s15 = int_to_ptr.vmem [resolvable:$false] %s1216_s15 }
  0x19   : > { %s1218_s16 = scalar_lea.vmem %s1217_s15, 5120  ;;  %p1219_p5 = scmp.lt.s32.totalorder %s147_s5, %s1217_s15 }
  0x1a   : > { %p1214_p3 = pnand %p1212_p2, %p1200_p1  ;;  %p1220_p6 = scmp.lt.s32.totalorder %s1218_s16, %s1211_s7 }
  0x1c   : > { %p1215_p4 = pneg %p1214_p3  ;;  %p1221_p7 = por %p1220_p6, %p1219_p5 }
  0x1e   : > { %p1222_p10 = pnand %p1221_p7, %p1215_p4 }
  0x20   : > { %1225 = shalt.err (!%p1222_p10)
}
  0x21   : > { %1136 = dma.hbm_to_vmem [thread:$0]  (!%p1433_p0), %s144_s3, 2560, %s147_s5, %s134_s6  }
  0x22   : > { %s1124_s18 = smul.u32 320, %s1427_s25  ;;  %s164_s26 = scalar_lea.hbm %s1595_s1, %s1121_s27 }
  0x23   : > { %p1115_p13 = scmp.ge.s32.totalorder %s1338_s14, 1  ;;  %p173_p2 = scmp.lt.s32.totalorder %s1338_s14, 3 }
  0x24   : > { %s157_s30 = scalar_lea.vmem [#allocation5], %s1124_s18  ;;  %s154_s7 = scalar_lea.sflag [#allocation6], %s1427_s25 }
  0x25   : > { %p1454_p3 = pnand %p1115_p13, %p173_p2  ;;  %s165_s4 = sshll.u32 %s157_s30, 4  ;;  %s166_s4 = int_to_ptr.vmem [resolvable:$true] %s165_s4 }
  0x26   : > { %s1239_s8 = scalar_lea.vmem %s166_s4, 5120  ;;  %s1341_s3 = smov [#allocation5]  }
  0x27   : > { %p1240_p4 = scmp.ne.s32.totalorder %s166_s4, %s1239_s8  ;;  %s1244_s5 = sshll.u32 %s1341_s3, 4  ;;  %s1245_s5 = int_to_ptr.vmem [resolvable:$false] %s1244_s5 }
  0x28   : > { %s1246_s27 = scalar_lea.vmem %s1245_s5, 10240  ;;  %p1247_p7 = scmp.lt.s32.totalorder %s166_s4, %s1245_s5 }
  0x29   : > { %p1242_p5 = pnand %p1240_p4, %p1200_p1  ;;  %p1248_p10 = scmp.lt.s32.totalorder %s1246_s27, %s1239_s8 }
  0x2b   : > { %p1243_p6 = pneg %p1242_p5  ;;  %p1249_p13 = por %p1248_p10, %p1247_p7 }
  0x2d   : > { %p1250_p2 = pnand %p1249_p13, %p1243_p6 }
  0x2f   : > { %1253 = shalt.err (!%p1250_p2)
}
  0x30   : > { %s1342_s6 = smov 5120   ;;  %s1343_s15 = smov 2560  }
  0x31   : > { %s1344_s16 = smov 160   ;;  %177 = sbr.rel (%p1454_p3) target bundleno = 313 (0x139), region = 28 }
  0x32   : > { %1139 = dma.hbm_to_vmem [thread:$0]  (!%p1433_p0), %s164_s26, 5120, %s166_s4, %s154_s7, %s1342_s6, %s1343_s15, %s1344_s16  }
  0x33   : > { %s1467_s25 = sand.u32 (!%p1454_p3), 1, %s1322_s10  }
  0x34   : > { %s1125_s18 = smul.u32 (!%p1454_p3), 160, %s1467_s25  ;;  %s180_s19 = scalar_lea.sflag (!%p1454_p3), [#allocation3], %s1467_s25 }
  0x36   : > { %s1471_s20 = scalar_lea.vmem [#allocation2], %s1125_s18 }
  0x37   : > { %1305 = dma.done.wait (%p1409_p8), %s180_s19, 2560  }
  0x38   : > { %1307 = vsyncadd (%p1409_p8), %s180_s19, 4294964736  ;;  %s1126_s28 = smul.u32 320, %s1467_s25  ;;  %s189_s26 = scalar_lea.sflag [#allocation6], %s1467_s25 }
  0x3a   : > { %s1479_s29 = scalar_lea.vmem [#allocation5], %s1126_s28 }
  0x3b   : > { %1309 = dma.done.wait (%p1409_p8), %s189_s26, 5120  }
  0x3c   : > { %1311 = vsyncadd (%p1409_p8), %s189_s26, 4294962176  ;;  %v270_v0 = vld [vmem:[%s1479_s29 + $0xa8] sm:$0xff]  ;;  %v272_v1 = vld [vmem:[%s1479_s29 + $0xb8] sm:$0xff]  ;;  %s1116_s21 = sshll.u32 %s1467_s25, 3  ;;  %vm226_vm0 = vcmask 130048   ;;  %v1345_v60 = vmov 0.0  }
  0x3d   : > { %v269_v2 = vld [vmem:[%s1479_s29 + $0xa0] sm:$0xff]  ;;  %317 = vmatprep.subr.mxu0 %v270_v0  ;;  %387 = vmatprep.subr.mxu1 %v272_v1  ;;  %v271_v3 = vld [vmem:[%s1479_s29 + $0xb0] sm:$0xff]  ;;  %v250_v4 = vld [vmem:[%s1479_s29 + $0x8] sm:$0xff]  ;;  %s1546_s30 = scalar_lea.vmem [#allocation7], %s1116_s21  ;;  %s1118_s4 = sshll.u32 %s1330_s12, 7 }
  0x3e   : > { %v252_v5 = vld [vmem:[%s1479_s29 + $0x18] sm:$0xff]  ;;  %318 = vmatpush1.xpose.msra.mxu0 %v269_v2  ;;  %388 = vmatpush1.xpose.msra.mxu1 %v271_v3  ;;  %v230_v6 = vld [vmem:[%s1471_s20 + $0x8] sm:$0xff]  ;;  %v249_v7 = vld [vmem:[%s1479_s29] sm:$0xff]  ;;  %227 = vst.msk [vmem:[%s1546_s30] sm:$0xff] %vm226_vm0, %v1345_v60  ;;  %s1006_s7 = sshll.u32 %s1546_s30, 4  ;;  %s1004_s5 = scalar_lea.hbm %s1596_s2, %s1118_s4  ;;  %s1007_s7 = int_to_ptr.vmem [resolvable:$true] %s1006_s7 }
  0x3f   : > { %319 = vmatprep.subr.mxu0 %v250_v4  ;;  %389 = vmatprep.subr.mxu1 %v252_v5  ;;  %v251_v8 = vld [vmem:[%s1479_s29 + $0x10] sm:$0xff]  ;;  %v232_v9 = vld [vmem:[%s1471_s20 + $0x18] sm:$0xff]  ;;  %v274_v10 = vld [vmem:[%s1479_s29 + $0xc8] sm:$0xff]  ;;  %s993_s27 = scalar_lea.sflag [#allocation4], %s1467_s25  ;;  %s1254_s6 = scalar_lea.vmem %s1007_s7, 128 }
  0x40   : > { %353 = vmatprep.mubr.f32.mxu0 %v230_v6  ;;  %423 = vmatprep.mubr.f32.mxu1 %v232_v9  ;;  %v276_v11 = vld [vmem:[%s1479_s29 + $0xd8] sm:$0xff]  ;;  %v229_v12 = vld [vmem:[%s1471_s20] sm:$0xff]  ;;  %v231_v13 = vld [vmem:[%s1471_s20 + $0x10] sm:$0xff]  ;;  %p1255_p8 = scmp.ne.s32.totalorder %s1007_s7, %s1254_s6  ;;  %s1346_s15 = smov [#allocation7]  }
  0x41   : > { %v273_v14 = vld [vmem:[%s1479_s29 + $0xc0] sm:$0xff]  ;;  %v275_v15 = vld [vmem:[%s1479_s29 + $0xd0] sm:$0xff]  ;;  %v254_v16 = vld [vmem:[%s1479_s29 + $0x28] sm:$0xff]  ;;  %s1258_s16 = sshll.u32 %s1346_s15, 4  ;;  %s1259_s16 = int_to_ptr.vmem [resolvable:$false] %s1258_s16 }
  0x42   : > { %320 = vmatpush1.xpose.msra.mxu0 %v249_v7  ;;  %390 = vmatpush1.xpose.msra.mxu1 %v251_v8  ;;  %v256_v17 = vld [vmem:[%s1479_s29 + $0x38] sm:$0xff]  ;;  %v234_v18 = vld [vmem:[%s1471_s20 + $0x28] sm:$0xff]  ;;  %v253_v20 = vld [vmem:[%s1479_s29 + $0x20] sm:$0xff]  ;;  %p1256_p0 = pnand %p1255_p8, %p1413_p9  ;;  %s1260_s12 = scalar_lea.vmem %s1259_s16, 256 }
  0x43   : > { %457 = vmatprep.subr.mxu0 %v274_v10  ;;  %527 = vmatprep.subr.mxu1 %v276_v11  ;;  %v236_v19 = vld [vmem:[%s1471_s20 + $0x38] sm:$0xff]  ;;  %v255_v21 = vld [vmem:[%s1479_s29 + $0x30] sm:$0xff]  ;;  %v278_v22 = vld [vmem:[%s1479_s29 + $0xe8] sm:$0xff]  ;;  %p1261_p3 = scmp.lt.s32.totalorder %s1007_s7, %s1259_s16  ;;  %p1262_p4 = scmp.lt.s32.totalorder %s1260_s12, %s1254_s6 }
  0x44   : > { %v280_v23 = vld [vmem:[%s1479_s29 + $0xf8] sm:$0xff]  ;;  %v233_v24 = vld [vmem:[%s1471_s20 + $0x20] sm:$0xff]  ;;  %v235_v25 = vld [vmem:[%s1471_s20 + $0x30] sm:$0xff]  ;;  %p1257_p1 = pneg %p1256_p0 }
  0x45   : > { %354 = vmatmul.mubr.f32.vlgmr.msra.gmra.mxu0 %v229_v12  ;;  %424 = vmatmul.mubr.f32.vlgmr.msra.gmra.mxu1 %v231_v13  ;;  %v277_v26 = vld [vmem:[%s1479_s29 + $0xe0] sm:$0xff]  ;;  %v279_v27 = vld [vmem:[%s1479_s29 + $0xf0] sm:$0xff]  ;;  %v258_v28 = vld [vmem:[%s1479_s29 + $0x48] sm:$0xff]  ;;  %p1263_p5 = por %p1262_p4, %p1261_p3 }
  0x46   : > { %458 = vmatpush1.xpose.msra.mxu0 %v273_v14  ;;  %528 = vmatpush1.xpose.msra.mxu1 %v275_v15  ;;  %v260_v29 = vld [vmem:[%s1479_s29 + $0x58] sm:$0xff]  ;;  %v238_v30 = vld [vmem:[%s1471_s20 + $0x48] sm:$0xff]  ;;  %v257_v32 = vld [vmem:[%s1479_s29 + $0x40] sm:$0xff] }
  0x47   : > { %459 = vmatprep.subr.mxu0 %v254_v16  ;;  %529 = vmatprep.subr.mxu1 %v256_v17  ;;  %v240_v31 = vld [vmem:[%s1471_s20 + $0x58] sm:$0xff]  ;;  %v259_v33 = vld [vmem:[%s1479_s29 + $0x50] sm:$0xff]  ;;  %v282_v34 = vld [vmem:[%s1479_s29 + $0x108] sm:$0xff]  ;;  %p1264_p6 = pnand %p1263_p5, %p1257_p1 }
  0x48   : > { %493 = vmatprep.mubr.f32.mxu0 %v234_v18  ;;  %563 = vmatprep.mubr.f32.mxu1 %v236_v19  ;;  %v284_v35 = vld [vmem:[%s1479_s29 + $0x118] sm:$0xff]  ;;  %v237_v36 = vld [vmem:[%s1471_s20 + $0x40] sm:$0xff]  ;;  %v239_v37 = vld [vmem:[%s1471_s20 + $0x50] sm:$0xff] }
  0x49   : > { %v281_v38 = vld [vmem:[%s1479_s29 + $0x100] sm:$0xff]  ;;  %v283_v39 = vld [vmem:[%s1479_s29 + $0x110] sm:$0xff]  ;;  %v262_v40 = vld [vmem:[%s1479_s29 + $0x68] sm:$0xff] }
  0x4a   : > { %460 = vmatpush1.xpose.msra.mxu0 %v253_v20  ;;  %530 = vmatpush1.xpose.msra.mxu1 %v255_v21  ;;  %v264_v41 = vld [vmem:[%s1479_s29 + $0x78] sm:$0xff]  ;;  %v242_v42 = vld [vmem:[%s1471_s20 + $0x68] sm:$0xff]  ;;  %v261_v44 = vld [vmem:[%s1479_s29 + $0x60] sm:$0xff] }
  0x4b   : > { %597 = vmatprep.subr.mxu0 %v278_v22  ;;  %667 = vmatprep.subr.mxu1 %v280_v23  ;;  %v244_v43 = vld [vmem:[%s1471_s20 + $0x78] sm:$0xff]  ;;  %v263_v45 = vld [vmem:[%s1479_s29 + $0x70] sm:$0xff]  ;;  %v286_v46 = vld [vmem:[%s1479_s29 + $0x128] sm:$0xff] }
  0x4c   : > { %v288_v47 = vld [vmem:[%s1479_s29 + $0x138] sm:$0xff]  ;;  %v241_v48 = vld [vmem:[%s1471_s20 + $0x60] sm:$0xff]  ;;  %v243_v49 = vld [vmem:[%s1471_s20 + $0x70] sm:$0xff] }
  0x4d   : > { %494 = vmatmul.mubr.f32.vlgmr.msra.gmra.mxu0 %v233_v24  ;;  %564 = vmatmul.mubr.f32.vlgmr.msra.gmra.mxu1 %v235_v25  ;;  %v285_v50 = vld [vmem:[%s1479_s29 + $0x120] sm:$0xff]  ;;  %v287_v51 = vld [vmem:[%s1479_s29 + $0x130] sm:$0xff]  ;;  %v266_v52 = vld [vmem:[%s1479_s29 + $0x88] sm:$0xff] }
  0x4e   : > { %598 = vmatpush1.xpose.msra.mxu0 %v277_v26  ;;  %668 = vmatpush1.xpose.msra.mxu1 %v279_v27  ;;  %v268_v53 = vld [vmem:[%s1479_s29 + $0x98] sm:$0xff]  ;;  %v246_v54 = vld [vmem:[%s1471_s20 + $0x88] sm:$0xff]  ;;  %v265_v56 = vld [vmem:[%s1479_s29 + $0x80] sm:$0xff] }
  0x4f   : > { %599 = vmatprep.subr.mxu0 %v258_v28  ;;  %669 = vmatprep.subr.mxu1 %v260_v29  ;;  %v248_v55 = vld [vmem:[%s1471_s20 + $0x98] sm:$0xff]  ;;  %v267_v57 = vld [vmem:[%s1479_s29 + $0x90] sm:$0xff]  ;;  %v245_v58 = vld [vmem:[%s1471_s20 + $0x80] sm:$0xff] }
  0x50   : > { %633 = vmatprep.mubr.f32.mxu0 %v238_v30  ;;  %703 = vmatprep.mubr.f32.mxu1 %v240_v31  ;;  %v247_v59 = vld [vmem:[%s1471_s20 + $0x90] sm:$0xff]  ;;  %v228_v23 = vld [vmem:[%s1546_s30] sm:$0xff] }
  0x52   : > { %600 = vmatpush1.xpose.msra.mxu0 %v257_v32  ;;  %670 = vmatpush1.xpose.msra.mxu1 %v259_v33 }
  0x53   : > { %737 = vmatprep.subr.mxu0 %v282_v34  ;;  %807 = vmatprep.subr.mxu1 %v284_v35 }
  0x55   : > { %634 = vmatmul.mubr.f32.vlgmr.msra.gmra.mxu0 %v237_v36  ;;  %704 = vmatmul.mubr.f32.vlgmr.msra.gmra.mxu1 %v239_v37 }
  0x56   : > { %738 = vmatpush1.xpose.msra.mxu0 %v281_v38  ;;  %808 = vmatpush1.xpose.msra.mxu1 %v283_v39 }
  0x57   : > { %739 = vmatprep.subr.mxu0 %v262_v40  ;;  %809 = vmatprep.subr.mxu1 %v264_v41 }
  0x58   : > { %773 = vmatprep.mubr.f32.mxu0 %v242_v42  ;;  %843 = vmatprep.mubr.f32.mxu1 %v244_v43 }
  0x5a   : > { %740 = vmatpush1.xpose.msra.mxu0 %v261_v44  ;;  %810 = vmatpush1.xpose.msra.mxu1 %v263_v45 }
  0x5b   : > { %877 = vmatprep.subr.mxu0 %v286_v46  ;;  %947 = vmatprep.subr.mxu1 %v288_v47 }
  0x5d   : > { %774 = vmatmul.mubr.f32.vlgmr.msra.gmra.mxu0 %v241_v48  ;;  %844 = vmatmul.mubr.f32.vlgmr.msra.gmra.mxu1 %v243_v49 }
  0x5e   : > { %878 = vmatpush1.xpose.msra.mxu0 %v285_v50  ;;  %948 = vmatpush1.xpose.msra.mxu1 %v287_v51 }
  0x5f   : > { %879 = vmatprep.subr.mxu0 %v266_v52  ;;  %949 = vmatprep.subr.mxu1 %v268_v53 }
  0x60   : > { %913 = vmatprep.mubr.f32.mxu0 %v246_v54  ;;  %983 = vmatprep.mubr.f32.mxu1 %v248_v55 }
  0x62   : > { %880 = vmatpush1.xpose.msra.mxu0 %v265_v56  ;;  %950 = vmatpush1.xpose.msra.mxu1 %v267_v57 }
  0x65   : > { %914 = vmatmul.mubr.f32.vlgmr.msra.gmra.mxu0 %v245_v58  ;;  %984 = vmatmul.mubr.f32.vlgmr.msra.gmra.mxu1 %v247_v59 }
 0x105   : > { %v355_v61 = vpop.f32.mrf.mxu0  ;;  %v425_v62 = vpop.f32.mrf.mxu1 }
 0x106   : > { %v426_v5 = vadd.f32 %v425_v62, %v355_v61 }
 0x107   : > { %v357_v63 = vpop.f32.mrf.mxu0  ;;  %v427_v0 = vpop.f32.mrf.mxu1 }
 0x10d   : > { %v495_v1 = vpop.f32.mrf.mxu0  ;;  %v565_v2 = vpop.f32.mrf.mxu1 }
 0x10e   : > { %v496_v6 = vadd.f32 %v495_v1, %v426_v5 }
 0x10f   : > { %v497_v3 = vpop.f32.mrf.mxu0  ;;  %v567_v4 = vpop.f32.mrf.mxu1 }
 0x110   : > { %v566_v11 = vadd.f32 %v565_v2, %v496_v6 }
 0x115   : > { %v635_v7 = vpop.f32.mrf.mxu0  ;;  %v705_v8 = vpop.f32.mrf.mxu1 }
 0x116   : > { %v636_v12 = vadd.f32 %v635_v7, %v566_v11 }
 0x117   : > { %v637_v9 = vpop.f32.mrf.mxu0  ;;  %v707_v10 = vpop.f32.mrf.mxu1 }
 0x118   : > { %v706_v15 = vadd.f32 %v705_v8, %v636_v12 }
 0x11d   : > { %v775_v13 = vpop.f32.mrf.mxu0  ;;  %v845_v14 = vpop.f32.mrf.mxu1 }
 0x11e   : > { %v776_v18 = vadd.f32 %v775_v13, %v706_v15 }
 0x11f   : > { %v777_v16 = vpop.f32.mrf.mxu0  ;;  %v847_v17 = vpop.f32.mrf.mxu1 }
 0x120   : > { %v846_v19 = vadd.f32 %v845_v14, %v776_v18 }
 0x125   : > { %v915_v20 = vpop.f32.mrf.mxu0  ;;  %v985_v21 = vpop.f32.mrf.mxu1 }
 0x126   : > { %v916_v22 = vadd.f32 %v915_v20, %v846_v19 }
 0x127   : > { %v917_v24 = vpop.f32.mrf.mxu0  ;;  %v987_v25 = vpop.f32.mrf.mxu1 }
 0x128   : > { %v986_v26 = vadd.f32 %v985_v21, %v916_v22 }
 0x12a   : > { %v989_v27 = vadd.f32 %v986_v26, %v228_v23 }
 0x12c   : > { %991 = vst.msk [vmem:[%s1546_s30] sm:$0xff] %vm226_vm0, %v989_v27 }
 0x12d   : > { %1267 = shalt.err (!%p1264_p6)
}
 0x12e   : > { %s1268_s18 = scalar_lea.hbm %s1004_s5, 128  ;;  %s1272_s20 = scalar_lea.hbm %s1596_s2, 256 }
 0x12f   : > { %p1269_p7 = scmp.ne.s32.totalorder %s1004_s5, %s1268_s18  ;;  %p1273_p2 = scmp.lt.s32.totalorder %s1004_s5, %s1596_s2 }
 0x130   : > { %p1274_p8 = scmp.lt.s32.totalorder %s1272_s20, %s1268_s18 }
 0x131   : > { %p1270_p10 = pnand %p1269_p7, %p1413_p9 }
 0x132   : > { %p1275_p0 = por %p1274_p8, %p1273_p2 }
 0x133   : > { %p1271_p13 = pneg %p1270_p10 }
 0x135   : > { %p1276_p12 = pnand %p1275_p0, %p1271_p13 }
 0x137   : > { %1279 = shalt.err (!%p1276_p12)
}
 0x138   : > { %1131 = dma.vmem_to_hbm [thread:$0]  (%p1413_p9), %s1007_s7, 128, %s1004_s5, %s993_s27  }
 0x139 PF: > { %s1018_s29 = sand.u32 1, %s1318_s9   ;;  %p1603_p1 = scmp.ge.s32.totalorder %s1338_s14, 2 }
 0x13a   : > { %s1019_s21 = scalar_lea.sflag [#allocation4], %s1018_s29 }
 0x13b   : > { %p1141_p3 = pnand %p1603_p1, %p1420_p11 }
 0x13d   : > { %p1142_p4 = pneg %p1141_p3 }
 0x13f   : > { %1313 = dma.done.wait (%p1142_p4), %s1019_s21, 128  }
 0x140   : > { %1315 = vsyncadd (%p1142_p4), %s1019_s21, 4294967168  ;;  %s21_s14 = sadd.s32 1, %s1338_s14   ;;  %s1604_s9 = smov %s1322_s10 }
 0x141   : > { %p18_p5 = scmp.ge.s32.totalorder %s21_s14, 4   ;;  %s1605_s10 = smov %s1326_s11 }
 0x142   : > { %s1606_s11 = smov %s1418_s23  ;;  %s1607_s12 = smov %s1334_s13 }
 0x143   : > { %s1608_s13 = smov %s1610_s17  ;;  %20 = sbr.rel (!%p18_p5) target bundleno = 8 (0x8), region = 90 }
 0x148   :  { %1024 = vsyncpa [#allocation3], 1 }
 0x149   :  { %1026 = vsyncpa [#allocation3 + $0x1], 1 }
 0x14a   :  { %1027 = vsyncpa [#allocation6], 1 }
 0x14b   :  { %1029 = vsyncpa [#allocation6 + $0x1], 1 }
 0x14c   :  { %1030 = vsyncpa [#allocation4], 1 }
 0x14d   :  { %1032 = vsyncpa [#allocation4 + $0x1], 1 }

</bundles_post_ra>
